<compile_context>
chip_gen: v7x
topology: tpu7x:2x2x1
jax: 0.10.0
libtpu: 0.0.40
codegen_flags: <defaults>
</compile_context>

<pallas_src>
import jax
import jax.numpy as jnp
from jax.experimental import pallas as pl
from jax.experimental.pallas import tpu as pltpu


# ---------------------------------------------------------------------------
# Kernels
# ---------------------------------------------------------------------------

def linear_kernel(x_ref, w_ref, b_ref, o_ref):
    """o = x @ W + b for one row tile. bf16 operands, f32 accumulation."""
    y = jnp.dot(x_ref[...], w_ref[...], preferred_element_type=jnp.float32) + b_ref[...]
    o_ref[...] = y.astype(o_ref.dtype)


def make_prop_relu_linear_kernel(tk, rhs_resident):
    """acc += adj_tile @ h_tile over the K grid axis; at the last K step:
       o = relu(acc) @ W + b  (fuses graph propagation, ReLU and the next Linear).
       If rhs_resident, h_ref holds the whole (n_pad, h) RHS in VMEM and is sliced here."""
    def kernel(adj_ref, h_ref, w_ref, b_ref, o_ref, acc_ref):
        k = pl.program_id(1)

        @pl.when(k == 0)
        def _():
            acc_ref[...] = jnp.zeros_like(acc_ref)

        if rhs_resident:
            off = pl.multiple_of(k * tk, tk)
            h_blk = h_ref[pl.ds(off, tk), :]
        else:
            h_blk = h_ref[...]

        acc_ref[...] += jnp.dot(adj_ref[...], h_blk,
                                preferred_element_type=jnp.float32)

        @pl.when(k == pl.num_programs(1) - 1)
        def _():
            h = jnp.maximum(acc_ref[...], 0.0)
            # TODO(synk): training-mode dropout (pltpu.prng_* mask on `h`) not emitted;
            #             module is evaluated in inference mode -> identity.
            y = jnp.dot(h.astype(w_ref.dtype), w_ref[...],
                        preferred_element_type=jnp.float32) + b_ref[...]
            # NOTE: padded rows of o equal b (bias added to zero rows); harmless because the
            # matching adj columns in the next stage are zero, but do not reuse those rows.
            o_ref[...] = y.astype(o_ref.dtype)

    return kernel


def make_prop_relu_head_kernel(tk, rhs_resident):
    """acc += adj_tile @ h_tile over the K grid axis; at the last K step:
       emb = relu(acc); logits = emb @ W3 + b3; logp = log_softmax(logits, axis=1)."""
    def kernel(adj_ref, h_ref, w_ref, b_ref, logp_ref, emb_ref, acc_ref):
        k = pl.program_id(1)

        @pl.when(k == 0)
        def _():
            acc_ref[...] = jnp.zeros_like(acc_ref)

        if rhs_resident:
            off = pl.multiple_of(k * tk, tk)
            h_blk = h_ref[pl.ds(off, tk), :]
        else:
            h_blk = h_ref[...]

        acc_ref[...] += jnp.dot(adj_ref[...], h_blk,
                                preferred_element_type=jnp.float32)

        @pl.when(k == pl.num_programs(1) - 1)
        def _():
            emb = jnp.maximum(acc_ref[...], 0.0)
            emb_ref[...] = emb.astype(emb_ref.dtype)          # bf16 writeback
            logits = jnp.dot(emb.astype(w_ref.dtype), w_ref[...],
                             preferred_element_type=jnp.float32) + b_ref[...]
            m = jnp.max(logits, axis=1, keepdims=True)
            s = logits - m
            lse = jnp.log(jnp.sum(jnp.exp(s), axis=1, keepdims=True))
            logp_ref[...] = s - lse                            # kept f32 (b3 pad = -1e30)

    return kernel


# ---------------------------------------------------------------------------
# Wrapper helpers
# ---------------------------------------------------------------------------

def _round_up(x, m):
    return (x + m - 1) // m * m


def _pad2(a, rows, cols):
    out = jnp.zeros((rows, cols), a.dtype)
    return out.at[: a.shape[0], : a.shape[1]].set(a)


def _vmem_limit_bytes():
    """Generation-aware scoped-VMEM limit: ~3/4 of physical, capped at 100 MiB."""
    cap = None
    try:
        info = pltpu.get_tpu_info()
        cap = getattr(info, "vmem_capacity_bytes", None)
    except Exception:
        cap = None
    if not cap:
        cap = 64 * 1024 * 1024          # conservative fallback (v7x-sized)
    return min(int(cap) * 3 // 4, 100 * 1024 * 1024)


def _pick_tm(n):
    """Row tile: prefer an even number (>=2) of row tiles so v7x's 2 TCs stay balanced."""
    for tm in (512, 256, 128):
        n_pad = _round_up(n, tm)
        tiles = n_pad // tm
        if tiles >= 2 and tiles % 2 == 0:
            return tm
    return 128


def _pick_tk(n_pad, tm, vmem_limit, override=None, tk_target=1024):
    """K tile (adj contraction): as large as possible while dividing n_pad and keeping the
       double-buffered adj tile within a fraction of the VMEM budget."""
    if override is not None:
        assert n_pad % override == 0 and override % 128 == 0
        return override
    tk = 128
    while (tk * 2 <= min(tk_target, n_pad)
           and n_pad % (tk * 2) == 0
           and 2 * tm * (tk * 2) * 2 <= vmem_limit // 4):
        tk *= 2
    return tk


# ---------------------------------------------------------------------------
# Forward
# ---------------------------------------------------------------------------

def gnn_forward(x_in, adj, params, *, tile=None, tile_k=None):
    """params: dict w1,b1,w2,b2,w3,b3; weights [in, out], biases [1, out]."""
    n, n_feat = x_in.shape
    h1 = params["w1"].shape[1]
    h2 = params["w2"].shape[1]
    c = params["w3"].shape[1]

    f32, bf16 = jnp.float32, jnp.bfloat16
    vmem_limit = _vmem_limit_bytes()

    # Lane-align feature/class widths to 128; row/K-tile the node dimension.
    fp, h1p, h2p, cp = (_round_up(d, 128) for d in (n_feat, h1, h2, c))
    tm = tile if tile is not None else _pick_tm(n)
    n_pad = _round_up(n, tm)
    tk = _pick_tk(n_pad, tm, vmem_limit, override=tile_k)
    n_row_tiles = n_pad // tm
    n_k_tiles = n_pad // tk

    # Keep the propagation RHS (n_pad x h) fully VMEM-resident when it fits comfortably
    # (budgeted at 2x for buffering headroom); otherwise stream (tk, h) blocks per K step.
    h_max = max(h1p, h2p)
    rhs_resident = (2 * n_pad * h_max * 2) <= vmem_limit // 3
    rhs_reads = 1 if rhs_resident else n_row_tiles

    # Stage-1 row tile: enlarge (power-of-two multiples of tm that divide n_pad) so the tiny
    # fc1 GEMM is only a handful of grid steps.
    tm1 = tm
    while (n_pad % (tm1 * 2) == 0
           and (2 * (tm1 * 2) * fp * 2 + 2 * (tm1 * 2) * h1p * 2
                + fp * h1p * 2 + h1p * 4) <= vmem_limit // 2):
        tm1 *= 2

    # Zero-pad and cast MXU operands to bf16; biases stay f32.
    # (bf16 adj is fine for inference with f32 accumulation; for very large graphs consider
    #  keeping adj in f32.)
    x_p = _pad2(x_in, n_pad, fp).astype(bf16)
    adj_p = _pad2(adj, n_pad, n_pad).astype(bf16)
    w1 = _pad2(params["w1"], fp, h1p).astype(bf16)
    b1 = _pad2(params["b1"], 1, h1p).astype(f32)
    w2 = _pad2(params["w2"], h1p, h2p).astype(bf16)
    b2 = _pad2(params["b2"], 1, h2p).astype(f32)
    w3 = _pad2(params["w3"], h2p, cp).astype(bf16)
    # Padded class columns get a huge negative bias so they vanish under f32 log_softmax.
    b3 = jnp.full((1, cp), -1e30, f32).at[:, :c].set(params["b3"].astype(f32))

    cp_lin = pltpu.CompilerParams(dimension_semantics=("parallel",),
                                  vmem_limit_bytes=vmem_limit)
    cp_prop = pltpu.CompilerParams(dimension_semantics=("parallel", "arbitrary"),
                                   vmem_limit_bytes=vmem_limit)

    # ---- Stage 1: h1_pre = x @ W1 + b1 (tiny GEMM, <1% of flops) ----
    h1_pre = pl.pallas_call(
        linear_kernel,
        out_shape=jax.ShapeDtypeStruct((n_pad, h1p), bf16),
        grid=(n_pad // tm1,),
        in_specs=[pl.BlockSpec((tm1, fp), lambda i: (i, 0)),
                  pl.BlockSpec((fp, h1p), lambda i: (0, 0)),
                  pl.BlockSpec((1, h1p), lambda i: (0, 0))],
        out_specs=pl.BlockSpec((tm1, h1p), lambda i: (i, 0)),
        compiler_params=cp_lin,
        cost_estimate=pl.CostEstimate(
            flops=2 * n_pad * fp * h1p,
            transcendentals=0,
            bytes_accessed=2 * (n_pad * fp + fp * h1p + n_pad * h1p)),
    )(x_p, w1, b1)

    # ---- Stage 2: h2_pre = relu(adj @ h1_pre) @ W2 + b2 ----
    rhs1_spec = (pl.BlockSpec((n_pad, h1p), lambda i, k: (0, 0)) if rhs_resident
                 else pl.BlockSpec((tk, h1p), lambda i, k: (k, 0)))
    h2_pre = pl.pallas_call(
        make_prop_relu_linear_kernel(tk, rhs_resident),
        out_shape=jax.ShapeDtypeStruct((n_pad, h2p), bf16),
        grid=(n_row_tiles, n_k_tiles),
        in_specs=[pl.BlockSpec((tm, tk), lambda i, k: (i, k)),
                  rhs1_spec,
                  pl.BlockSpec((h1p, h2p), lambda i, k: (0, 0)),
                  pl.BlockSpec((1, h2p), lambda i, k: (0, 0))],
        out_specs=pl.BlockSpec((tm, h2p), lambda i, k: (i, 0)),
        scratch_shapes=[pltpu.VMEM((tm, h1p), f32)],
        compiler_params=cp_prop,
        cost_estimate=pl.CostEstimate(
            flops=2 * n_pad * n_pad * h1p + 2 * n_pad * h1p * h2p,
            transcendentals=0,
            bytes_accessed=(2 * n_pad * n_pad
                            + 2 * rhs_reads * n_pad * h1p
                            + 2 * h1p * h2p + 4 * h2p
                            + 2 * n_pad * h2p)),
    )(adj_p, h1_pre, w2, b2)

    # ---- Stage 3: emb = relu(adj @ h2_pre); logp = log_softmax(emb @ W3 + b3) ----
    rhs2_spec = (pl.BlockSpec((n_pad, h2p), lambda i, k: (0, 0)) if rhs_resident
                 else pl.BlockSpec((tk, h2p), lambda i, k: (k, 0)))
    logp_p, emb_p = pl.pallas_call(
        make_prop_relu_head_kernel(tk, rhs_resident),
        out_shape=(jax.ShapeDtypeStruct((n_pad, cp), f32),
                   jax.ShapeDtypeStruct((n_pad, h2p), bf16)),
        grid=(n_row_tiles, n_k_tiles),
        in_specs=[pl.BlockSpec((tm, tk), lambda i, k: (i, k)),
                  rhs2_spec,
                  pl.BlockSpec((h2p, cp), lambda i, k: (0, 0)),
                  pl.BlockSpec((1, cp), lambda i, k: (0, 0))],
        out_specs=(pl.BlockSpec((tm, cp), lambda i, k: (i, 0)),
                   pl.BlockSpec((tm, h2p), lambda i, k: (i, 0))),
        scratch_shapes=[pltpu.VMEM((tm, h2p), f32)],
        compiler_params=cp_prop,
        cost_estimate=pl.CostEstimate(
            flops=2 * n_pad * n_pad * h2p + 2 * n_pad * h2p * cp,
            transcendentals=n_pad * cp,
            bytes_accessed=(2 * n_pad * n_pad
                            + 2 * rhs_reads * n_pad * h2p
                            + 2 * h2p * cp + 4 * cp
                            + 4 * n_pad * cp + 2 * n_pad * h2p)),
    )(adj_p, h2_pre, w3, b3)

    # TODO(synk): at production graph sizes, the dense N x N adjacency matmuls should be
    #             replaced by a CSR-style scalar-prefetch gather (PrefetchScalarGridSpec with
    #             per-row neighbor offsets driving the index_map / manual DMA) — the >10x lever.
    return logp_p[:n, :c], emb_p[:n, :h2].astype(f32)


def init_params(key, n_feat, n_hidden_1, n_hidden_2, n_class):
    """Deterministic synthetic init; Linear weight stored transposed as [in, out]."""
    ks = jax.random.split(key, 6)

    def lin(kw, kb, fan_in, fan_out):
        bound = 1.0 / jnp.sqrt(fan_in)
        w = jax.random.uniform(kw, (fan_in, fan_out), jnp.float32, -bound, bound)
        b = jax.random.uniform(kb, (1, fan_out), jnp.float32, -bound, bound)
        return w, b

    w1, b1 = lin(ks[0], ks[1], n_feat, n_hidden_1)
    w2, b2 = lin(ks[2], ks[3], n_hidden_1, n_hidden_2)
    w3, b3 = lin(ks[4], ks[5], n_hidden_2, n_class)
    return {"w1": w1, "b1": b1, "w2": w2, "b2": b2, "w3": w3, "b3": b3}


if __name__ == "__main__":
    # Small synthetic problem; tile=128 / tile_k=128 so the demo exercises a real (2 x 2) grid
    # with K-accumulation and the in-kernel pl.ds slicing of the VMEM-resident RHS
    # (N=200 -> padded to 256).
    N, n_feat, n_hidden_1, n_hidden_2, n_class = 200, 32, 64, 32, 8

    key = jax.random.PRNGKey(0)
    k_x, k_a, k_p = jax.random.split(key, 3)

    x_in = jax.random.normal(k_x, (N, n_feat), jnp.float32)

    # Symmetric normalized-ish dense adjacency (self-loops + random edges).
    a = (jax.random.uniform(k_a, (N, N)) < 0.3).astype(jnp.float32)
    a = jnp.maximum(a, a.T) + jnp.eye(N, dtype=jnp.float32)
    deg = jnp.sum(a, axis=1, keepdims=True)
    adj = a / deg

    params = init_params(k_p, n_feat, n_hidden_1, n_hidden_2, n_class)

    log_probs, embeddings = gnn_forward(x_in, adj, params, tile=128, tile_k=128)
    jax.block_until_ready((log_probs, embeddings))

    # Pure-JAX f32 reference of the same math (kernel uses bf16 MXU operands,
    # f32 accumulation, so tolerances are loosened accordingly).
    h1 = jnp.maximum(adj @ (x_in @ params["w1"] + params["b1"]), 0.0)
    emb_ref = jnp.maximum(adj @ (h1 @ params["w2"] + params["b2"]), 0.0)
    logits_ref = emb_ref @ params["w3"] + params["b3"]
    logp_ref = jax.nn.log_softmax(logits_ref, axis=1)

    assert log_probs.shape == (N, n_class)
    assert embeddings.shape == (N, n_hidden_2)
    assert jnp.allclose(log_probs, logp_ref, atol=5e-2, rtol=5e-2)
    assert jnp.allclose(embeddings, emb_ref, atol=5e-2, rtol=5e-2)

    print("KERNEL_OK")
</pallas_src>

<mosaic_0001>
module attributes {stable_mosaic.version = 11 : i64} {
  func.func @linear_kernel(%arg0: i32, %arg1: memref<256x128xbf16, #tpu.memory_space<vmem>>, %arg2: memref<128x128xbf16, #tpu.memory_space<vmem>>, %arg3: memref<1x128xf32, #tpu.memory_space<vmem>>, %arg4: memref<256x128xbf16, #tpu.memory_space<vmem>>) attributes {dimension_semantics = [#tpu.dimension_semantics<parallel>], iteration_bounds = array<i64: 1>, scalar_prefetch = 0 : i64, scratch_operands = 0 : i64, tpu.core_type = #tpu.core_type<tc>, window_params = [{transform_indices = @transform_0, window_bounds = array<i64: 256, 128>}, {pipeline_mode = #tpu.pipeline_mode<synchronous>, transform_indices = @transform_1, window_bounds = array<i64: 128, 128>}, {pipeline_mode = #tpu.pipeline_mode<synchronous>, transform_indices = @transform_2, window_bounds = array<i64: 1, 128>}, {transform_indices = @transform_3, window_bounds = array<i64: 256, 128>}]} {
    %c0 = arith.constant 0 : index
    %c0_0 = arith.constant 0 : index
    %0 = vector.load %arg1[%c0, %c0_0] : memref<256x128xbf16, #tpu.memory_space<vmem>>, vector<256x128xbf16>
    %c0_1 = arith.constant 0 : index
    %c0_2 = arith.constant 0 : index
    %1 = vector.load %arg2[%c0_1, %c0_2] : memref<128x128xbf16, #tpu.memory_space<vmem>>, vector<128x128xbf16>
    %cst = arith.constant dense<0.000000e+00> : vector<256x128xf32>
    %2 = tpu.matmul %0, %1, %cst {dimension_numbers = #tpu.dot_dimension_numbers<[1], [0], [0], [1], [0, 0, 1, 1], [], []>} : vector<256x128xbf16>, vector<128x128xbf16>, vector<256x128xf32> -> vector<256x128xf32>
    %c0_3 = arith.constant 0 : index
    %c0_4 = arith.constant 0 : index
    %3 = vector.load %arg3[%c0_3, %c0_4] : memref<1x128xf32, #tpu.memory_space<vmem>>, vector<1x128xf32>
    %4 = vector.broadcast %3 : vector<1x128xf32> to vector<256x128xf32>
    %5 = arith.addf %2, %4 : vector<256x128xf32>
    %6 = arith.truncf %5 : vector<256x128xf32> to vector<256x128xbf16>
    %c0_5 = arith.constant 0 : index
    %c0_6 = arith.constant 0 : index
    %7 = vector.load %arg4[%c0_5, %c0_6] : memref<256x128xbf16, #tpu.memory_space<vmem>>, vector<256x128xbf16>
    tpu.vector_store %arg4[%c0_5, %c0_6], %6 {strides = array<i32>} : memref<256x128xbf16, #tpu.memory_space<vmem>>, vector<256x128xbf16>,
    return
  }
  func.func @transform_0(%arg0: i32) -> (i32, i32) {
    %c0_i32 = arith.constant 0 : i32
    %c0_i32_0 = arith.constant 0 : i32
    return %arg0, %c0_i32 : i32, i32
  }
  func.func @transform_1(%arg0: i32) -> (i32, i32) {
    %c0_i32 = arith.constant 0 : i32
    %c0_i32_0 = arith.constant 0 : i32
    %c0_i32_1 = arith.constant 0 : i32
    return %c0_i32, %c0_i32_0 : i32, i32
  }
  func.func @transform_2(%arg0: i32) -> (i32, i32) {
    %c0_i32 = arith.constant 0 : i32
    %c0_i32_0 = arith.constant 0 : i32
    %c0_i32_1 = arith.constant 0 : i32
    return %c0_i32, %c0_i32_0 : i32, i32
  }
  func.func @transform_3(%arg0: i32) -> (i32, i32) {
    %c0_i32 = arith.constant 0 : i32
    %c0_i32_0 = arith.constant 0 : i32
    return %arg0, %c0_i32 : i32, i32
  }
}

</mosaic_0001>

<bundles_post_ra>
// kernel: tpu_custom_call.1
= control target key start
LH: loop header
LB: loop body
LE: loop exit
PB: predicated region body
PF: predicated region fallthrough
CT: control target
= control target key end

     0   :  { %8 = vsyncpa [#allocation3], 0  ;;  %s1062_s0 = inlined_call_operand.hbm [shape: bf16[256,128], index: 0, kind: input, shape index: {}]   ;;  %s1063_s1 = inlined_call_operand.hbm [shape: bf16[128,128], index: 1, kind: input, shape index: {}]   ;;  %s1064_s2 = inlined_call_operand.vmem [shape: f32[1,128], index: 2, kind: input, shape index: {}]   ;;  %s1065_s3 = inlined_call_operand.hbm [shape: bf16[256,128], index: 3, kind: output, shape index: {}]  }
   0x1   :  { %9 = vsyncpa [#allocation6], 0 }
   0x2   :  { %10 = vsyncpa [#allocation4], 0  ;;  %s955_s12 = smov [#allocation2]   ;;  %s883_s16 = scalar_lea.hbm %s1062_s0, 2048 }
   0x3   :  { %s16_s13 = sshll.u32 %s955_s12, 4  ;;  %p884_p0 = scmp.ne.s32.totalorder %s1062_s0, %s883_s16  ;;  %s17_s13 = int_to_ptr.vmem [resolvable:$true] %s16_s13 }
   0x4   :  { %p887_p1 = scmp.lt.u32.totalorder %s883_s16, %s1062_s0 }
   0x6   :  { %p889_p2 = pnand %p887_p1, %p884_p0 }
   0x8   :  { %892 = shalt.err (!%p889_p2)
}
   0x9   :  { %s893_s21 = scalar_lea.vmem %s17_s13, 2048  ;;  %p898_p4 = scmp.lt.s32.totalorder %s17_s13, %s17_s13 }
   0xa   :  { %p894_p3 = scmp.ne.s32.totalorder %s17_s13, %s893_s21  ;;  %p899_p5 = scmp.lt.s32.totalorder %s893_s21, %s893_s21 }
   0xc   :  { %p900_p6 = por %p899_p5, %p898_p4 }
   0xe   :  { %p901_p7 = pnand %p900_p6, %p894_p3 }
  0x10   :  { %904 = shalt.err (!%p901_p7)
}
  0x11   :  { %s956_s22 = smov 64   ;;  %s957_s23 = smov 4  }
  0x12   :  { %22 = dma.hbm_to_vmem [thread:$0]  %s1062_s0, 2048, %s17_s13, [#allocation3], %s956_s22, %s956_s22, %s957_s23  }
  0x13   :  { %s958_s26 = smov [#allocation5]   ;;  %s905_s30 = scalar_lea.hbm %s1063_s1, 1024 }
  0x14   :  { %s28_s27 = sshll.u32 %s958_s26, 4  ;;  %p906_p8 = scmp.ne.s32.totalorder %s1063_s1, %s905_s30  ;;  %s29_s27 = int_to_ptr.vmem [resolvable:$true] %s28_s27 }
  0x15   :  { %p909_p9 = scmp.lt.u32.totalorder %s905_s30, %s1063_s1 }
  0x17   :  { %p911_p10 = pnand %p909_p9, %p906_p8 }
  0x19   :  { %914 = shalt.err (!%p911_p10)
}
  0x1a   :  { %s915_s8 = scalar_lea.vmem %s29_s27, 1024  ;;  %p920_p12 = scmp.lt.s32.totalorder %s29_s27, %s29_s27 }
  0x1b   :  { %p916_p11 = scmp.ne.s32.totalorder %s29_s27, %s915_s8  ;;  %p921_p13 = scmp.lt.s32.totalorder %s915_s8, %s915_s8 }
  0x1d   :  { %p922_p0 = por %p921_p13, %p920_p12 }
  0x1f   :  { %p923_p1 = pnand %p922_p0, %p916_p11 }
  0x21   :  { %926 = shalt.err (!%p923_p1)
}
  0x22   :  { %34 = dma.hbm_to_vmem [thread:$0]  %s1063_s1, 1024, %s29_s27, [#allocation6], %s956_s22, %s956_s22, %s957_s23  }
  0x23   :  { %949 = dma.done.wait [#allocation3], 2048  }
  0x24   :  { %950 = vsyncadd [#allocation3], 4294965248 }
  0x25   :  { %951 = dma.done.wait [#allocation6], 1024  }
  0x26   :  { %952 = vsyncadd [#allocation6], 4294966272  ;;  %v859_v0 = vld [vmem:[#allocation5] sm:$0xff]   ;;  %v860_v1 = vld [vmem:[#allocation5 + $0x8] sm:$0xff]  }
  0x27   :  { %790 = vmatprep.subr.bf16.mxu0 %v859_v0  ;;  %838 = vmatprep.subr.bf16.mxu1 %v859_v0  ;;  %v861_v2 = vld [vmem:[#allocation5 + $0x10] sm:$0xff]   ;;  %v862_v3 = vld [vmem:[#allocation5 + $0x18] sm:$0xff]   ;;  %v867_v4 = vld [vmem:[#allocation2] sm:$0xff]  }
  0x28   :  { %791 = vmatpush3.bf16.msra.mxu0 %v859_v0  ;;  %846 = vmatpush3.bf16.msra.mxu1 %v859_v0  ;;  %v868_v5 = vld [vmem:[#allocation2 + $0x40] sm:$0xff]   ;;  %v864_v7 = vld [vmem:[#allocation5 + $0x28] sm:$0xff]   ;;  %v865_v8 = vld [vmem:[#allocation5 + $0x30] sm:$0xff]  }
  0x29   :  { %792 = vmatprep.subr.bf16.mxu0 %v860_v1  ;;  %839 = vmatprep.subr.bf16.mxu1 %v860_v1  ;;  %v863_v6 = vld [vmem:[#allocation5 + $0x20] sm:$0xff]   ;;  %v866_v9 = vld [vmem:[#allocation5 + $0x38] sm:$0xff]   ;;  %v869_v10 = vld [vmem:[#allocation2 + $0x8] sm:$0xff]  }
  0x2a   :  { %806 = vmatprep.mubr.bf16.mxu0 %v867_v4  ;;  %822 = vmatprep.mubr.bf16.mxu1 %v868_v5  ;;  %v870_v11 = vld [vmem:[#allocation2 + $0x48] sm:$0xff]   ;;  %v871_v12 = vld [vmem:[#allocation2 + $0x10] sm:$0xff]   ;;  %v873_v14 = vld [vmem:[#allocation2 + $0x18] sm:$0xff]  }
  0x2b   :  { %v872_v13 = vld [vmem:[#allocation2 + $0x50] sm:$0xff]   ;;  %v874_v15 = vld [vmem:[#allocation2 + $0x58] sm:$0xff]   ;;  %v875_v16 = vld [vmem:[#allocation2 + $0x20] sm:$0xff]  }
  0x2c   :  { %793 = vmatpush3.bf16.msra.mxu0 %v860_v1  ;;  %847 = vmatpush3.bf16.msra.mxu1 %v860_v1  ;;  %v876_v17 = vld [vmem:[#allocation2 + $0x60] sm:$0xff]   ;;  %v877_v18 = vld [vmem:[#allocation2 + $0x28] sm:$0xff]   ;;  %v879_v20 = vld [vmem:[#allocation2 + $0x30] sm:$0xff]  }
  0x2d   :  { %794 = vmatprep.subr.bf16.mxu0 %v861_v2  ;;  %840 = vmatprep.subr.bf16.mxu1 %v861_v2  ;;  %v878_v19 = vld [vmem:[#allocation2 + $0x68] sm:$0xff]   ;;  %v880_v21 = vld [vmem:[#allocation2 + $0x70] sm:$0xff]   ;;  %v881_v22 = vld [vmem:[#allocation2 + $0x38] sm:$0xff]  }
  0x2e   :  { %v882_v23 = vld [vmem:[#allocation2 + $0x78] sm:$0xff]   ;;  %v1013_v25 = vld [vmem:[%s1064_s2] ss:$0 sm:$0xff]  ;;  %s959_s2 = smov [#allocation7]  }
  0x2f   :  { %s569_s11 = sshll.u32 %s959_s2, 4  ;;  %s570_s11 = int_to_ptr.vmem [resolvable:$true] %s569_s11 }
  0x30   :  { %795 = vmatpush3.bf16.msra.mxu0 %v861_v2  ;;  %848 = vmatpush3.bf16.msra.mxu1 %v861_v2  ;;  %s927_s12 = scalar_lea.vmem %s570_s11, 2048  ;;  %p932_p3 = scmp.lt.s32.totalorder %s570_s11, %s570_s11 }
  0x31   :  { %796 = vmatprep.subr.bf16.mxu0 %v862_v3  ;;  %841 = vmatprep.subr.bf16.mxu1 %v862_v3  ;;  %p928_p2 = scmp.ne.s32.totalorder %s570_s11, %s927_s12  ;;  %p933_p4 = scmp.lt.s32.totalorder %s927_s12, %s927_s12 }
  0x33   :  { %p934_p5 = por %p933_p4, %p932_p3 }
  0x34   :  { %797 = vmatpush3.bf16.msra.mxu0 %v862_v3  ;;  %849 = vmatpush3.bf16.msra.mxu1 %v862_v3 }
  0x35   :  { %798 = vmatprep.subr.bf16.mxu0 %v863_v6  ;;  %842 = vmatprep.subr.bf16.mxu1 %v863_v6  ;;  %p935_p6 = pnand %p934_p5, %p928_p2 }
  0x38   :  { %799 = vmatpush3.bf16.msra.mxu0 %v863_v6  ;;  %850 = vmatpush3.bf16.msra.mxu1 %v863_v6 }
  0x39   :  { %800 = vmatprep.subr.bf16.mxu0 %v864_v7  ;;  %843 = vmatprep.subr.bf16.mxu1 %v864_v7 }
  0x3c   :  { %801 = vmatpush3.bf16.msra.mxu0 %v864_v7  ;;  %851 = vmatpush3.bf16.msra.mxu1 %v864_v7 }
  0x3d   :  { %802 = vmatprep.subr.bf16.mxu0 %v865_v8  ;;  %844 = vmatprep.subr.bf16.mxu1 %v865_v8 }
  0x40   :  { %803 = vmatpush3.bf16.msra.mxu0 %v865_v8  ;;  %852 = vmatpush3.bf16.msra.mxu1 %v865_v8 }
  0x41   :  { %804 = vmatprep.subr.bf16.mxu0 %v866_v9  ;;  %845 = vmatprep.subr.bf16.mxu1 %v866_v9 }
  0x44   :  { %805 = vmatpush3.bf16.msra.mxu0 %v866_v9  ;;  %853 = vmatpush3.bf16.msra.mxu1 %v866_v9 }
  0x47   :  { %807 = vmatmul.mubr.bf16.vlgmr.msra.gmra.mrb[0].mxu0 %v869_v10  ;;  %823 = vmatmul.mubr.bf16.vlgmr.msra.gmra.mrb[0].mxu1 %v870_v11 }
  0x48   :  { %810 = vmatprep.mubr.bf16.mxu0 %v871_v12  ;;  %826 = vmatprep.mubr.bf16.mxu1 %v872_v13 }
  0x4f   :  { %811 = vmatmul.mubr.bf16.gmra.mrb[4].mxu0 %v873_v14  ;;  %827 = vmatmul.mubr.bf16.gmra.mrb[4].mxu1 %v874_v15 }
  0x50   :  { %814 = vmatprep.mubr.bf16.mxu0 %v875_v16  ;;  %830 = vmatprep.mubr.bf16.mxu1 %v876_v17 }
  0x57   :  { %815 = vmatmul.mubr.bf16.gmra.mrb[8].mxu0 %v877_v18  ;;  %831 = vmatmul.mubr.bf16.gmra.mrb[8].mxu1 %v878_v19 }
  0x58   :  { %818 = vmatprep.mubr.bf16.mxu0 %v879_v20  ;;  %834 = vmatprep.mubr.bf16.mxu1 %v880_v21 }
  0x5f   :  { %819 = vmatmul.mubr.bf16.gmra.mrb[12].mxu0 %v881_v22  ;;  %835 = vmatmul.mubr.bf16.gmra.mrb[12].mxu1 %v882_v23 }
 0x11a   :  { %v808_v24 = vpop.f32.mrb[0].mxu0  ;;  %v824_v26 = vpop.f32.mrb[0].mxu1 }
 0x11b   :  { %v277_v27 = vpop.f32.mrb[1].mxu0  ;;  %v341_v28 = vpop.f32.mrb[1].mxu1  ;;  %v286_v31 = vadd.f32 %v808_v24, %v1013_v25  ;;  %v350_v32 = vadd.f32 %v824_v26, %v1013_v25 }
 0x11c   :  { %v809_v29 = vpop.f32.mrb[2].mxu0  ;;  %v825_v30 = vpop.f32.mrb[2].mxu1  ;;  %v278_v37 = vadd.f32 %v1013_v25, %v277_v27  ;;  %v342_v38 = vadd.f32 %v1013_v25, %v341_v28 }
 0x11d   :  { %v289_v33 = vadd.f32 %v809_v29, %v1013_v25  ;;  %v353_v34 = vadd.f32 %v825_v30, %v1013_v25  ;;  %v280_v35 = vpop.f32.mrb[3].mxu0  ;;  %v344_v36 = vpop.f32.mrb[3].mxu1 }
 0x11e   :  { %v281_v39 = vadd.f32 %v1013_v25, %v280_v35  ;;  %v345_v40 = vadd.f32 %v1013_v25, %v344_v36 }
 0x11f   :  { %v679_v41 = vpack.c.bf16 %v289_v33, %v286_v31  ;;  %v719_v42 = vpack.c.bf16 %v353_v34, %v350_v32 }
 0x120   :  { %v674_v43 = vpack.c.bf16 %v281_v39, %v278_v37  ;;  %v714_v44 = vpack.c.bf16 %v345_v40, %v342_v38 }
 0x121   :  { %751 = vst [vmem:[#allocation7 + $0x8] sm:$0xff] %v679_v41   ;;  %759 = vst [vmem:[#allocation7 + $0x48] sm:$0xff] %v719_v42  }
 0x122   :  { %675 = vst [vmem:[#allocation7] sm:$0xff] %v674_v43   ;;  %758 = vst [vmem:[#allocation7 + $0x40] sm:$0xff] %v714_v44   ;;  %v812_v45 = vpop.f32.mrb[4].mxu0  ;;  %v828_v46 = vpop.f32.mrb[4].mxu1 }
 0x123   :  { %v293_v47 = vpop.f32.mrb[5].mxu0  ;;  %v357_v48 = vpop.f32.mrb[5].mxu1  ;;  %v302_v51 = vadd.f32 %v812_v45, %v1013_v25  ;;  %v366_v52 = vadd.f32 %v828_v46, %v1013_v25 }
 0x124   :  { %v813_v49 = vpop.f32.mrb[6].mxu0  ;;  %v829_v50 = vpop.f32.mrb[6].mxu1  ;;  %v294_v57 = vadd.f32 %v1013_v25, %v293_v47  ;;  %v358_v58 = vadd.f32 %v1013_v25, %v357_v48 }
 0x125   :  { %v305_v53 = vadd.f32 %v813_v49, %v1013_v25  ;;  %v369_v54 = vadd.f32 %v829_v50, %v1013_v25  ;;  %v296_v55 = vpop.f32.mrb[7].mxu0  ;;  %v360_v56 = vpop.f32.mrb[7].mxu1 }
 0x126   :  { %v297_v59 = vadd.f32 %v1013_v25, %v296_v55  ;;  %v361_v60 = vadd.f32 %v1013_v25, %v360_v56 }
 0x127   :  { %v689_v61 = vpack.c.bf16 %v305_v53, %v302_v51  ;;  %v729_v62 = vpack.c.bf16 %v369_v54, %v366_v52 }
 0x128   :  { %v684_v63 = vpack.c.bf16 %v297_v59, %v294_v57  ;;  %v724_v0 = vpack.c.bf16 %v361_v60, %v358_v58 }
 0x129   :  { %753 = vst [vmem:[#allocation7 + $0x18] sm:$0xff] %v689_v61   ;;  %761 = vst [vmem:[#allocation7 + $0x58] sm:$0xff] %v729_v62  }
 0x12a   :  { %752 = vst [vmem:[#allocation7 + $0x10] sm:$0xff] %v684_v63   ;;  %760 = vst [vmem:[#allocation7 + $0x50] sm:$0xff] %v724_v0   ;;  %v816_v1 = vpop.f32.mrb[8].mxu0  ;;  %v832_v2 = vpop.f32.mrb[8].mxu1 }
 0x12b   :  { %v309_v3 = vpop.f32.mrb[9].mxu0  ;;  %v373_v4 = vpop.f32.mrb[9].mxu1  ;;  %v318_v7 = vadd.f32 %v816_v1, %v1013_v25  ;;  %v382_v8 = vadd.f32 %v832_v2, %v1013_v25 }
 0x12c   :  { %v817_v5 = vpop.f32.mrb[10].mxu0  ;;  %v833_v6 = vpop.f32.mrb[10].mxu1  ;;  %v310_v13 = vadd.f32 %v1013_v25, %v309_v3  ;;  %v374_v14 = vadd.f32 %v1013_v25, %v373_v4 }
 0x12d   :  { %v321_v9 = vadd.f32 %v817_v5, %v1013_v25  ;;  %v385_v10 = vadd.f32 %v833_v6, %v1013_v25  ;;  %v312_v11 = vpop.f32.mrb[11].mxu0  ;;  %v376_v12 = vpop.f32.mrb[11].mxu1 }
 0x12e   :  { %v313_v15 = vadd.f32 %v1013_v25, %v312_v11  ;;  %v377_v16 = vadd.f32 %v1013_v25, %v376_v12 }
 0x12f   :  { %v699_v17 = vpack.c.bf16 %v321_v9, %v318_v7  ;;  %v739_v18 = vpack.c.bf16 %v385_v10, %v382_v8 }
 0x130   :  { %v694_v19 = vpack.c.bf16 %v313_v15, %v310_v13  ;;  %v734_v20 = vpack.c.bf16 %v377_v16, %v374_v14 }
 0x131   :  { %755 = vst [vmem:[#allocation7 + $0x28] sm:$0xff] %v699_v17   ;;  %763 = vst [vmem:[#allocation7 + $0x68] sm:$0xff] %v739_v18  }
 0x132   :  { %754 = vst [vmem:[#allocation7 + $0x20] sm:$0xff] %v694_v19   ;;  %762 = vst [vmem:[#allocation7 + $0x60] sm:$0xff] %v734_v20   ;;  %v820_v21 = vpop.f32.mrb[12].mxu0  ;;  %v836_v22 = vpop.f32.mrb[12].mxu1 }
 0x133   :  { %v325_v23 = vpop.f32.mrb[13].mxu0  ;;  %v389_v24 = vpop.f32.mrb[13].mxu1  ;;  %v334_v28 = vadd.f32 %v820_v21, %v1013_v25  ;;  %v398_v29 = vadd.f32 %v836_v22, %v1013_v25 }
 0x134   :  { %v821_v26 = vpop.f32.mrb[14].mxu0  ;;  %v837_v27 = vpop.f32.mrb[14].mxu1  ;;  %v326_v34 = vadd.f32 %v1013_v25, %v325_v23  ;;  %v390_v35 = vadd.f32 %v1013_v25, %v389_v24 }
 0x135   :  { %v337_v30 = vadd.f32 %v821_v26, %v1013_v25  ;;  %v401_v31 = vadd.f32 %v837_v27, %v1013_v25  ;;  %v328_v32 = vpop.f32.mrb[15].mxu0  ;;  %v392_v33 = vpop.f32.mrb[15].mxu1 }
 0x136   :  { %v329_v36 = vadd.f32 %v1013_v25, %v328_v32  ;;  %v393_v37 = vadd.f32 %v1013_v25, %v392_v33 }
 0x137   :  { %v709_v38 = vpack.c.bf16 %v337_v30, %v334_v28  ;;  %v749_v39 = vpack.c.bf16 %v401_v31, %v398_v29 }
 0x138   :  { %v704_v40 = vpack.c.bf16 %v329_v36, %v326_v34  ;;  %v744_v41 = vpack.c.bf16 %v393_v37, %v390_v35 }
 0x139   :  { %757 = vst [vmem:[#allocation7 + $0x38] sm:$0xff] %v709_v38   ;;  %765 = vst [vmem:[#allocation7 + $0x78] sm:$0xff] %v749_v39  }
 0x13a   :  { %756 = vst [vmem:[#allocation7 + $0x30] sm:$0xff] %v704_v40   ;;  %764 = vst [vmem:[#allocation7 + $0x70] sm:$0xff] %v744_v41  }
 0x13b   :  { %938 = shalt.err (!%p935_p6)
}
 0x13c   :  { %s939_s15 = scalar_lea.hbm %s1065_s3, 2048 }
 0x13d   :  { %p940_p7 = scmp.ne.s32.totalorder %s1065_s3, %s939_s15  ;;  %p943_p8 = scmp.lt.u32.totalorder %s939_s15, %s1065_s3 }
 0x13f   :  { %p945_p9 = pnand %p943_p8, %p940_p7 }
 0x141   :  { %948 = shalt.err (!%p945_p9)
}
 0x142   :  { %575 = dma.vmem_to_hbm [thread:$0]  %s570_s11, 2048, %s1065_s3, [#allocation4], %s956_s22, %s956_s22, %s957_s23  }
 0x143   :  { %953 = dma.done.wait [#allocation4], 2048  }
 0x144   :  { %954 = vsyncadd [#allocation4], 4294965248 }
 0x145   :  { %579 = vsyncpa [#allocation3], 1 }
 0x146   :  { %580 = vsyncpa [#allocation6], 1 }
 0x147   :  { %581 = vsyncpa [#allocation4], 1 }

</bundles_post_ra>
